<compile_context>
chip_gen: v6e
topology: v6e:2x2x1
jax: 0.10.0
libtpu: 0.0.40
codegen_flags: <defaults>
</compile_context>

<pallas_src>
import functools

import jax
import jax.numpy as jnp
from jax.experimental import pallas as pl
from jax.experimental.pallas import tpu as pltpu

# Safe on v5e/v6e (128 MiB physical) and v7x (64 MiB physical) VMEM.
_VMEM_LIMIT_BYTES = 32 * 1024 * 1024


def autopad(k, p=None):
    if p is None:
        p = k // 2 if isinstance(k, int) else [x // 2 for x in k]
    return p


# ---------------------------------------------------------------------------
# k == 1 path: pointwise conv == flat matmul over (N*H*W, C1) x (C1, C2).
# ---------------------------------------------------------------------------
def _matmul_sig_kernel(x_ref, w_ref, o_ref, *, act, compute_dtype):
    acc = jnp.dot(x_ref[...].astype(compute_dtype),
                  w_ref[...].astype(compute_dtype),
                  preferred_element_type=jnp.float32)
    if act:
        acc = jax.nn.sigmoid(acc)          # EUP exp/recip, f32 epilogue
    o_ref[...] = acc.astype(o_ref.dtype)


def _conv_sig_1x1(x_nhwc, weight_oikk, *, act, compute_dtype):
    N, H, W, C1 = x_nhwc.shape
    C2 = weight_oikk.shape[0]
    M = N * H * W

    x2 = x_nhwc.reshape(M, C1)                               # contiguous, free
    w2 = jnp.transpose(weight_oikk.reshape(C2, C1), (1, 0))  # (C1, C2)

    # Lane-dense packing: fold G spatial rows together so the kernel's output
    # last dim is G*C2 == 128 (unmasked vst) and the contraction dim is G*C1.
    if 0 < C2 < 128 and 128 % C2 == 0 and (128 // C2) * C1 <= 2048:
        G = 128 // C2
    else:
        G = 1

    Mp = -(-M // G)                          # packed rows
    TM = 512 if Mp >= 512 else ((Mp + 7) // 8) * 8   # sublane multiple
    n_tiles = -(-Mp // TM)
    Mtot = n_tiles * TM * G
    if Mtot != M:
        x2 = jnp.pad(x2, ((0, Mtot - M), (0, 0)))
    xp = x2.reshape(n_tiles * TM, G * C1)

    # Block-diagonal weight: group g of a packed row only feeds the g-th
    # C2-slice of the packed output row.
    w_bd = w2 if G == 1 else jnp.kron(jnp.eye(G, dtype=w2.dtype), w2)

    out = pl.pallas_call(
        functools.partial(_matmul_sig_kernel, act=act,
                          compute_dtype=compute_dtype),
        out_shape=jax.ShapeDtypeStruct((n_tiles * TM, G * C2), x_nhwc.dtype),
        grid_spec=pltpu.PrefetchScalarGridSpec(
            num_scalar_prefetch=0,
            grid=(n_tiles,),
            in_specs=[
                pl.BlockSpec((TM, G * C1), lambda i: (i, 0)),
                pl.BlockSpec((G * C1, G * C2), lambda i: (0, 0)),
            ],
            out_specs=pl.BlockSpec((TM, G * C2), lambda i: (i, 0)),
        ),
        compiler_params=pltpu.CompilerParams(
            dimension_semantics=("parallel",),
            vmem_limit_bytes=_VMEM_LIMIT_BYTES),
    )(xp, w_bd)

    # (Mtot, C2) has the same row-major layout as (n_tiles*TM, G*C2): free.
    y = out.reshape(Mtot, C2)[:M].reshape(N, H, W, C2)
    return jnp.transpose(y, (0, 3, 1, 2))


# ---------------------------------------------------------------------------
# general k path: spatially tiled, halo window DMA'd from HBM per grid step.
# ---------------------------------------------------------------------------
def _largest_divisor_leq(n, cap):
    for d in range(min(cap, n), 0, -1):
        if n % d == 0:
            return d
    return 1


def _pick_w_tile(extent, cap):
    # Second-to-last output block dim: must be a multiple of 8 or full extent.
    for d in range(min(cap, extent), 0, -1):
        if extent % d == 0 and (d % 8 == 0 or d == extent):
            return d
    return extent


def _convsig_tiled_kernel(x_hbm, w_ref, o_ref, xbuf, sem, *,
                          k, TH, TW, act, compute_dtype):
    n = pl.program_id(0)
    hi = pl.program_id(1)
    wi = pl.program_id(2)
    C1 = xbuf.shape[-1]
    C2 = o_ref.shape[-1]

    # Halo window DMA: HBM -> VMEM scratch, bounded by the tile, not the image.
    h0 = pl.multiple_of(hi * TH, TH)
    w0 = pl.multiple_of(wi * TW, TW)
    cp = pltpu.make_async_copy(
        x_hbm.at[n, pl.ds(h0, TH + k - 1), pl.ds(w0, TW + k - 1), :],
        xbuf, sem)
    cp.start()
    cp.wait()
    # TODO(synk): double-buffer the halo DMA across (hi, wi) steps to hide the
    # copy latency under the matmuls.

    acc = jnp.zeros((TH * TW, C2), jnp.float32)
    for kh in range(k):                 # small static k -> unrolled MXU dots
        for kw in range(k):
            xs = xbuf[kh:kh + TH, kw:kw + TW, :].astype(compute_dtype)
            acc = acc + jnp.dot(xs.reshape(TH * TW, C1),
                                w_ref[kh, kw].astype(compute_dtype),
                                preferred_element_type=jnp.float32)
    if act:
        acc = jax.nn.sigmoid(acc)
    o_ref[0] = acc.reshape(TH, TW, C2).astype(o_ref.dtype)


def _conv_sig_general(x_nhwc, weight_oikk, *, k, act, compute_dtype):
    N, Hp, Wp, C1 = x_nhwc.shape
    C2 = weight_oikk.shape[0]
    Hout, Wout = Hp - k + 1, Wp - k + 1
    assert Hout >= 1 and Wout >= 1, "kernel larger than (padded) input"

    # Tile sizes: divisors of the output extent, capped so the halo input tile
    # stays small and the f32 accumulator stays <= 128 KiB (no vreg spills).
    itemsize = x_nhwc.dtype.itemsize
    cap_h = cap_w = 64
    while True:
        TH = _largest_divisor_leq(Hout, cap_h)
        TW = _pick_w_tile(Wout, cap_w)
        in_bytes = (TH + k - 1) * (TW + k - 1) * C1 * itemsize
        acc_bytes = TH * TW * C2 * 4
        if (in_bytes <= 2 * 1024 * 1024 and acc_bytes <= 128 * 1024) or \
                (cap_h == 1 and cap_w == 1):
            break
        cap_h = max(1, cap_h // 2)
        cap_w = max(1, cap_w // 2)

    w_khwc = jnp.transpose(weight_oikk, (2, 3, 1, 0))   # (k, k, C1, C2)

    out_nhwc = pl.pallas_call(
        functools.partial(_convsig_tiled_kernel, k=k, TH=TH, TW=TW,
                          act=act, compute_dtype=compute_dtype),
        out_shape=jax.ShapeDtypeStruct((N, Hout, Wout, C2), x_nhwc.dtype),
        grid_spec=pltpu.PrefetchScalarGridSpec(
            num_scalar_prefetch=0,
            grid=(N, Hout // TH, Wout // TW),
            in_specs=[
                pl.BlockSpec(memory_space=pl.ANY),   # x stays in HBM
                pl.BlockSpec((k, k, C1, C2), lambda n, hi, wi: (0, 0, 0, 0)),
            ],
            out_specs=pl.BlockSpec((1, TH, TW, C2),
                                   lambda n, hi, wi: (n, hi, wi, 0)),
            scratch_shapes=[
                pltpu.VMEM((TH + k - 1, TW + k - 1, C1), x_nhwc.dtype),
                pltpu.SemaphoreType.DMA,
            ],
        ),
        compiler_params=pltpu.CompilerParams(
            dimension_semantics=("parallel", "parallel", "parallel"),
            vmem_limit_bytes=_VMEM_LIMIT_BYTES),
    )(x_nhwc, w_khwc)
    return jnp.transpose(out_nhwc, (0, 3, 1, 2))


# ---------------------------------------------------------------------------
# public wrappers
# ---------------------------------------------------------------------------
def conv_sig(x_nchw, weight_oikk, *, k=1, s=1, p=None, g=1, act=True,
             compute_dtype=jnp.float32):
    """nn.Conv2d(c1, c2, k, s, autopad(k, p), groups=g, bias=False) followed
    by Sigmoid (act=True) or Identity (act=False), as Pallas TPU kernels.

    x_nchw:      (N, C1, H, W)   PyTorch NCHW
    weight_oikk: (C2, C1, k, k)  PyTorch OIHW
    compute_dtype: jnp.float32 (exact) or jnp.bfloat16 (fast MXU operands;
                   accumulation + sigmoid stay in f32).
    """
    assert s == 1, "only stride=1 implemented"
    assert g == 1, "only groups=1 implemented"
    # TODO(synk): stride>1 / groups>1 paths not implemented (module defaults).
    pad = autopad(k, p)

    N, C1, H, W = x_nchw.shape
    C2, C1w, kh, kw = weight_oikk.shape
    assert C1w == C1 and kh == k and kw == k

    # NCHW -> NHWC so channels sit on the lane axis inside the kernel.
    # TODO(synk): if the surrounding model is kept in NHWC, these transposes
    # and the pad round-trip disappear.
    x_nhwc = jnp.transpose(x_nchw, (0, 2, 3, 1))
    if pad:
        x_nhwc = jnp.pad(x_nhwc, ((0, 0), (pad, pad), (pad, pad), (0, 0)))

    if k == 1:
        # Module default: pointwise conv == flat matmul (no halo machinery).
        return _conv_sig_1x1(x_nhwc, weight_oikk, act=act,
                             compute_dtype=compute_dtype)
    return _conv_sig_general(x_nhwc, weight_oikk, k=k, act=act,
                             compute_dtype=compute_dtype)


def netd_final_conv(feat_nchw, weight_oikk, *, compute_dtype=jnp.float32):
    """NetD.final_conv head: Conv2d(C, 1, 4, 1, 0, bias=False) + Sigmoid,
    then the .view(-1, 1).squeeze(1) flatten of the classifier."""
    k = weight_oikk.shape[-1]
    y = conv_sig(feat_nchw, weight_oikk, k=k, p=0, act=True,
                 compute_dtype=compute_dtype)
    classifier = y.reshape(-1)
    return classifier, y


# ---------------------------------------------------------------------------
# reference + tests
# ---------------------------------------------------------------------------
def _reference_conv_sig(x_nchw, weight_oikk, k, p, act=True):
    pad = autopad(k, p)
    y = jax.lax.conv_general_dilated(
        x_nchw, weight_oikk, window_strides=(1, 1),
        padding=((pad, pad), (pad, pad)),
        dimension_numbers=("NCHW", "OIHW", "NCHW"))
    return jax.nn.sigmoid(y) if act else y


if __name__ == "__main__":
    key = jax.random.PRNGKey(0)
    kx, kw1, kw3, kf, kwf = jax.random.split(key, 5)

    # Small shapes for the generic ConvSig paths.
    N, C1, H, W = 2, 4, 16, 16
    C2 = 8
    x = jax.random.normal(kx, (N, C1, H, W), dtype=jnp.float32)

    # --- k=1 (module default): packed flat-matmul path ---------------------
    w1 = 0.1 * jax.random.normal(kw1, (C2, C1, 1, 1), dtype=jnp.float32)
    y1 = jax.block_until_ready(conv_sig(x, w1, k=1))
    r1 = _reference_conv_sig(x, w1, 1, None)
    assert jnp.allclose(y1, r1, atol=1e-5, rtol=1e-5), "k=1 mismatch"

    # --- k=3 (autopad=1): spatially tiled halo-DMA path ---------------------
    w3 = 0.1 * jax.random.normal(kw3, (C2, C1, 3, 3), dtype=jnp.float32)
    y3 = jax.block_until_ready(conv_sig(x, w3, k=3))
    r3 = _reference_conv_sig(x, w3, 3, None)
    assert jnp.allclose(y3, r3, atol=1e-5, rtol=1e-5), "k=3 mismatch"

    # --- act=False now skips the sigmoid inside the kernel ------------------
    y3n = jax.block_until_ready(conv_sig(x, w3, k=3, act=False))
    r3n = _reference_conv_sig(x, w3, 3, None, act=False)
    assert jnp.allclose(y3n, r3n, atol=1e-5, rtol=1e-5), "act=False mismatch"

    # --- bf16 MXU operands (v5e/v6e fast path), f32 accumulate/epilogue -----
    y1b = jax.block_until_ready(
        conv_sig(x, w1, k=1, compute_dtype=jnp.bfloat16))
    assert jnp.allclose(y1b, r1, atol=2e-2, rtol=0), "bf16 mismatch"

    # --- NetD.final_conv: Conv2d(1024, 1, 4, 1, 0) + Sigmoid + flatten ------
    feat = jax.random.normal(kf, (2, 1024, 4, 4), dtype=jnp.float32)
    wf = 0.02 * jax.random.normal(kwf, (1, 1024, 4, 4), dtype=jnp.float32)
    cls, ymap = netd_final_conv(feat, wf)
    cls = jax.block_until_ready(cls)
    rcls = _reference_conv_sig(feat, wf, 4, 0).reshape(-1)
    assert cls.shape == (2,), "classifier shape mismatch"
    assert jnp.allclose(cls, rcls, atol=5e-4, rtol=5e-4), "final_conv mismatch"

    print("KERNEL_OK")
</pallas_src>

<mosaic_0001>
module attributes {stable_mosaic.version = 11 : i64} {
  func.func @_matmul_sig_kernel(%arg0: i32, %arg1: memref<32x64xf32, #tpu.memory_space<vmem>>, %arg2: memref<64x128xf32, #tpu.memory_space<vmem>>, %arg3: memref<32x128xf32, #tpu.memory_space<vmem>>) attributes {dimension_semantics = [#tpu.dimension_semantics<parallel>], iteration_bounds = array<i64: 1>, scalar_prefetch = 0 : i64, scratch_operands = 0 : i64, tpu.core_type = #tpu.core_type<tc>, window_params = [{transform_indices = @transform_0, window_bounds = array<i64: 32, 64>}, {pipeline_mode = #tpu.pipeline_mode<synchronous>, transform_indices = @transform_1, window_bounds = array<i64: 64, 128>}, {transform_indices = @transform_2, window_bounds = array<i64: 32, 128>}]} {
    %c0 = arith.constant 0 : index
    %c0_0 = arith.constant 0 : index
    %0 = vector.load %arg1[%c0, %c0_0] : memref<32x64xf32, #tpu.memory_space<vmem>>, vector<32x64xf32>
    %c0_1 = arith.constant 0 : index
    %c0_2 = arith.constant 0 : index
    %1 = vector.load %arg2[%c0_1, %c0_2] : memref<64x128xf32, #tpu.memory_space<vmem>>, vector<64x128xf32>
    %cst = arith.constant dense<0.000000e+00> : vector<32x128xf32>
    %2 = tpu.matmul %0, %1, %cst {dimension_numbers = #tpu.dot_dimension_numbers<[1], [0], [0], [1], [0, 0, 1, 1], [], []>} : vector<32x64xf32>, vector<64x128xf32>, vector<32x128xf32> -> vector<32x128xf32>
    %3 = arith.negf %2 : vector<32x128xf32>
    %4 = math.exp %3 : vector<32x128xf32>
    %cst_3 = arith.constant 1.000000e+00 : f32
    %5 = vector.broadcast %cst_3 : f32 to vector<32x128xf32>
    %6 = arith.addf %5, %4 : vector<32x128xf32>
    %7 = arith.divf %5, %6 : vector<32x128xf32>
    %c0_4 = arith.constant 0 : index
    %c0_5 = arith.constant 0 : index
    %8 = vector.load %arg3[%c0_4, %c0_5] : memref<32x128xf32, #tpu.memory_space<vmem>>, vector<32x128xf32>
    tpu.vector_store %arg3[%c0_4, %c0_5], %7 {strides = array<i32>} : memref<32x128xf32, #tpu.memory_space<vmem>>, vector<32x128xf32>,
    return
  }
  func.func @transform_0(%arg0: i32) -> (i32, i32) {
    %c0_i32 = arith.constant 0 : i32
    %c0_i32_0 = arith.constant 0 : i32
    return %arg0, %c0_i32 : i32, i32
  }
  func.func @transform_1(%arg0: i32) -> (i32, i32) {
    %c0_i32 = arith.constant 0 : i32
    %c0_i32_0 = arith.constant 0 : i32
    %c0_i32_1 = arith.constant 0 : i32
    return %c0_i32, %c0_i32_0 : i32, i32
  }
  func.func @transform_2(%arg0: i32) -> (i32, i32) {
    %c0_i32 = arith.constant 0 : i32
    %c0_i32_0 = arith.constant 0 : i32
    return %arg0, %c0_i32 : i32, i32
  }
}

</mosaic_0001>

<bundles_post_ra>
// kernel: tpu_custom_call.1
= control target key start
LH: loop header
LB: loop body
LE: loop exit
PB: predicated region body
PF: predicated region fallthrough
CT: control target
= control target key end

     0   :  { %7 = vsyncpa [#allocation3], 0  ;;  %s379_s0 = inlined_call_operand.hbm [shape: f32[32,64], index: 0, kind: input, shape index: {}]   ;;  %s380_s1 = inlined_call_operand.hbm [shape: f32[64,128], index: 1, kind: input, shape index: {}]   ;;  %s381_s2 = inlined_call_operand.hbm [shape: f32[32,128], index: 2, kind: output, shape index: {}]  }
   0x1   :  { %8 = vsyncpa [#allocation6], 0 }
   0x2   :  { %9 = vsyncpa [#allocation4], 0  ;;  %s341_s9 = smov [#allocation2]  }
   0x3   :  { %s15_s10 = sshll.u32 %s341_s9, 4  ;;  %s16_s10 = int_to_ptr.vmem [resolvable:$true] %s15_s10 }
   0x4   :  { %s283_s11 = scalar_lea.vmem %s16_s10, 512  ;;  %p288_p1 = scmp.lt.s32.totalorder %s16_s10, %s16_s10 }
   0x5   :  { %p284_p0 = scmp.ne.s32.totalorder %s16_s10, %s283_s11  ;;  %p289_p2 = scmp.lt.s32.totalorder %s283_s11, %s283_s11 }
   0x7   :  { %p290_p3 = por %p289_p2, %p288_p1 }
   0x9   :  { %p291_p4 = pnand %p290_p3, %p284_p0 }
   0xb   :  { %294 = shalt.err (!%p291_p4)
}
   0xc   :  { %s342_s12 = smov 128   ;;  %s343_s13 = smov 8  }
   0xd   :  { %21 = dma.hbm_to_vmem [thread:$0]  %s379_s0, 512, %s16_s10, [#allocation3], %s342_s12, %s342_s12, %s343_s13  }
   0xe   :  { %s344_s16 = smov [#allocation5]  }
   0xf   :  { %s27_s17 = sshll.u32 %s344_s16, 4  ;;  %s28_s17 = int_to_ptr.vmem [resolvable:$true] %s27_s17 }
  0x10   :  { %s303_s18 = scalar_lea.vmem %s28_s17, 1024  ;;  %p308_p6 = scmp.lt.s32.totalorder %s28_s17, %s28_s17 }
  0x11   :  { %p304_p5 = scmp.ne.s32.totalorder %s28_s17, %s303_s18  ;;  %p309_p7 = scmp.lt.s32.totalorder %s303_s18, %s303_s18 }
  0x13   :  { %p310_p8 = por %p309_p7, %p308_p6 }
  0x15   :  { %p311_p9 = pnand %p310_p8, %p304_p5 }
  0x17   :  { %314 = shalt.err (!%p311_p9)
}
  0x18   :  { %33 = dma.hbm_to_vmem [thread:$0]  %s380_s1, 1024, %s28_s17, [#allocation6], %s342_s12, %s342_s12, %s343_s13  }
  0x19   :  { %335 = dma.done.wait [#allocation3], 512  }
  0x1a   :  { %336 = vsyncadd [#allocation3], 4294966784 }
  0x1b   :  { %337 = dma.done.wait [#allocation6], 1024  }
  0x1c   :  { %338 = vsyncadd [#allocation6], 4294966272  ;;  %v51_v0 = vld [vmem:[#allocation5 + $0x38] sm:$0xff]  ;;  %v50_v1 = vld [vmem:[#allocation5 + $0x30] sm:$0xff]  ;;  %vm52_vm0 = vcmask 523264   ;;  %s345_s0 = smov [#allocation7]  }
  0x1d   :  { %216 = vmatprep.subr.mxu0 %v51_v0  ;;  %238 = vmatprep.subr.mxu1 %v51_v0  ;;  %v49_v2 = vld [vmem:[#allocation5 + $0x28] sm:$0xff]  ;;  %v48_v3 = vld [vmem:[#allocation5 + $0x20] sm:$0xff]  ;;  %v47_v4 = vld [vmem:[#allocation5 + $0x18] sm:$0xff]  ;;  %s183_s1 = sshll.u32 %s345_s0, 4  ;;  %s184_s1 = int_to_ptr.vmem [resolvable:$true] %s183_s1 }
  0x1e   :  { %217 = vmatpush3.msra.mxu0 %v51_v0  ;;  %246 = vmatpush3.msra.mxu1 %v51_v0  ;;  %v46_v5 = vld [vmem:[#allocation5 + $0x10] sm:$0xff]  ;;  %v45_v6 = vld [vmem:[#allocation5 + $0x8] sm:$0xff]  ;;  %v44_v7 = vld [vmem:[#allocation5] sm:$0xff]  ;;  %s315_s21 = scalar_lea.vmem %s184_s1, 512  ;;  %p320_p11 = scmp.lt.s32.totalorder %s184_s1, %s184_s1 }
  0x1f   :  { %218 = vmatprep.subr.mxu0 %v50_v1  ;;  %239 = vmatprep.subr.mxu1 %v50_v1  ;;  %v40_v8 = vld [vmem:[#allocation2] sm:$0xff]  ;;  %v42_v9 = vld [vmem:[#allocation2 + $0x10] sm:$0xff]  ;;  %v41_v10 = vld [vmem:[#allocation2 + $0x8] sm:$0xff]  ;;  %p316_p10 = scmp.ne.s32.totalorder %s184_s1, %s315_s21  ;;  %p321_p12 = scmp.lt.s32.totalorder %s315_s21, %s315_s21 }
  0x20   :  { %219 = vmatpush3.msra.mxu0 %v50_v1  ;;  %247 = vmatpush3.msra.mxu1 %v50_v1  ;;  %v43_v11 = vld [vmem:[#allocation2 + $0x18] sm:$0xff] }
  0x21   :  { %220 = vmatprep.subr.mxu0 %v49_v2  ;;  %240 = vmatprep.subr.mxu1 %v49_v2  ;;  %p322_p13 = por %p321_p12, %p320_p11 }
  0x22   :  { %221 = vmatpush3.msra.mxu0 %v49_v2  ;;  %248 = vmatpush3.msra.mxu1 %v49_v2 }
  0x23   :  { %222 = vmatprep.subr.mxu0 %v48_v3  ;;  %241 = vmatprep.subr.mxu1 %v48_v3  ;;  %p323_p0 = pnand %p322_p13, %p316_p10 }
  0x24   :  { %223 = vmatpush3.msra.mxu0 %v48_v3  ;;  %249 = vmatpush3.msra.mxu1 %v48_v3 }
  0x25   :  { %224 = vmatprep.subr.mxu0 %v47_v4  ;;  %242 = vmatprep.subr.mxu1 %v47_v4 }
  0x26   :  { %225 = vmatpush3.msra.mxu0 %v47_v4  ;;  %250 = vmatpush3.msra.mxu1 %v47_v4 }
  0x27   :  { %226 = vmatprep.subr.mxu0 %v46_v5  ;;  %243 = vmatprep.subr.mxu1 %v46_v5 }
  0x28   :  { %227 = vmatpush3.msra.mxu0 %v46_v5  ;;  %251 = vmatpush3.msra.mxu1 %v46_v5 }
  0x29   :  { %228 = vmatprep.subr.mxu0 %v45_v6  ;;  %244 = vmatprep.subr.mxu1 %v45_v6 }
  0x2a   :  { %229 = vmatpush3.msra.mxu0 %v45_v6  ;;  %252 = vmatpush3.msra.mxu1 %v45_v6 }
  0x2b   :  { %230 = vmatprep.subr.mxu0 %v44_v7  ;;  %245 = vmatprep.subr.mxu1 %v44_v7 }
  0x2c   :  { %231 = vmatpush3.msra.mxu0 %v44_v7  ;;  %253 = vmatpush3.msra.mxu1 %v44_v7 }
  0x2d   :  { %232 = vmatprep.mubr.msk.f32.mxu0 %vm52_vm0, %v40_v8  ;;  %235 = vmatprep.mubr.msk.f32.mxu1 %vm52_vm0, %v42_v9 }
  0x2e   :  { %233 = vmatmul.mubr.msk.f32.vlgmr.msra.gmra.mxu0 %vm52_vm0, %v41_v10  ;;  %236 = vmatmul.mubr.msk.f32.vlgmr.msra.gmra.mxu1 %vm52_vm0, %v43_v11 }
  0xee   :  { %v234_v12 = vpop.f32.mrf.mxu0  ;;  %v237_v13 = vpop.f32.mrf.mxu1 }
  0xef   :  { %v201_v14 = vmul.f32 -1.442695, %v234_v12  ;;  %v203_v15 = vmul.f32 -1.442695, %v237_v13 }
  0xf0   :  { %v131_v16 = vpop.f32.mrf.mxu0  ;;  %v141_v17 = vpop.f32.mrf.mxu1 }
  0xf1   :  { %259 = vpow2.f32 %v201_v14  ;;  %v200_v18 = vmul.f32 -1.442695, %v131_v16  ;;  %v202_v19 = vmul.f32 -1.442695, %v141_v17 }
  0xf2   :  { %261 = vpow2.f32 %v203_v15 }
  0xf3   :  { %263 = vpow2.f32 %v200_v18 }
  0xf4   :  { %265 = vpow2.f32 %v202_v19 }
  0xfe   :  { %v260_v20 = vpop.eup %259 }
  0xff   :  { %v262_v21 = vpop.eup %261  ;;  %v163_v22 = vadd.f32 1.0, %v260_v20 }
 0x100   :  { %v264_v23 = vpop.eup %263  ;;  %v165_v24 = vadd.f32 1.0, %v262_v21 }
 0x101   :  { %v266_v25 = vpop.eup %265  ;;  %267 = vrcp.f32 %v163_v22  ;;  %v162_v26 = vadd.f32 1.0, %v264_v23 }
 0x102   :  { %269 = vrcp.f32 %v165_v24  ;;  %v164_v27 = vadd.f32 1.0, %v266_v25 }
 0x103   :  { %271 = vrcp.f32 %v162_v26 }
 0x104   :  { %273 = vrcp.f32 %v164_v27 }
 0x10e   :  { %v268_v28 = vpop.eup %267 }
 0x10f   :  { %v270_v29 = vpop.eup %269  ;;  %175 = vst [vmem:[#allocation7 + $0x8] sm:$0xff] %v268_v28 }
 0x110   :  { %v272_v30 = vpop.eup %271  ;;  %177 = vst [vmem:[#allocation7 + $0x18] sm:$0xff] %v270_v29 }
 0x111   :  { %v274_v31 = vpop.eup %273  ;;  %174 = vst [vmem:[#allocation7] sm:$0xff] %v272_v30 }
 0x112   :  { %176 = vst [vmem:[#allocation7 + $0x10] sm:$0xff] %v274_v31 }
 0x113   :  { %326 = shalt.err (!%p323_p0)
}
 0x114   :  { %189 = dma.vmem_to_hbm [thread:$0]  %s184_s1, 512, %s381_s2, [#allocation4], %s342_s12, %s342_s12, %s343_s13  }
 0x115   :  { %339 = dma.done.wait [#allocation4], 512  }
 0x116   :  { %340 = vsyncadd [#allocation4], 4294966784 }
 0x117   :  { %193 = vsyncpa [#allocation3], 1 }
 0x118   :  { %194 = vsyncpa [#allocation6], 1 }
 0x119   :  { %195 = vsyncpa [#allocation4], 1 }

</bundles_post_ra>
